<compile_context>
chip_gen: v5e
topology: v5e:2x2
jax: 0.10.0
libtpu: 0.0.40
codegen_flags: <defaults>
</compile_context>

<pallas_src>
import jax
import jax.numpy as jnp
from jax.experimental import pallas as pl
from jax.experimental.pallas import tpu as pltpu


def _se_kernel(x_ref, w1t_ref, w2t_ref, o_ref):
    # x_ref : (BT, C, HW)  NCHW-native: HW on lanes, C on sublanes.
    # w1t_ref: (C, Cr)     fc1 weight, pre-transposed (PyTorch layout (Cr, C)).
    # w2t_ref: (Cr, C)     fc2 weight, pre-transposed (PyTorch layout (C, Cr)).
    x = x_ref[...]                                             # (BT, C, HW)
    hw = x.shape[-1]

    # Squeeze: global average pool over the spatial (lane) axis. The reduce
    # accumulates in f32 (dtype=) so sub-32-bit inputs don't materialize a
    # full-tile f32 copy of x.
    pooled = jnp.sum(x, axis=-1, dtype=jnp.float32) * (1.0 / hw)      # (BT, C)

    # Excitation: fc1 -> ReLU -> fc2 -> sigmoid as tiny lane-dense row matmuls.
    h = jnp.dot(pooled, w1t_ref[...], preferred_element_type=jnp.float32)  # (BT, Cr)
    h = jnp.maximum(h, 0.0)
    s = jnp.dot(h, w2t_ref[...], preferred_element_type=jnp.float32)       # (BT, C)
    s = jax.nn.sigmoid(s)

    # Scale: broadcast the per-(b, c) gate across the spatial (lane) axis.
    # Gate is cast to x.dtype before the multiply: one extra rounding step for
    # bf16/fp16 inputs, but no full-tile f32 temporary.
    o_ref[...] = (x * s[:, :, None].astype(x.dtype)).astype(o_ref.dtype)


def _round_up(n, m):
    return (n + m - 1) // m * m


def _vmem_capacity_bytes():
    """Physical VMEM per TensorCore; conservative (v7x, 64 MiB) fallback."""
    try:
        cap = getattr(pltpu.get_tpu_info(), "vmem_capacity_bytes", None)
        if cap:
            return int(cap)
    except Exception:
        pass
    return 64 << 20


def _tile_vmem_bytes(bt, rows, cols, itemsize):
    """Padded VMEM footprint of one (bt, rows, cols) tile: lane dim pads to 128,
    sublane dim pads to 8 packed 32-bit rows (8/16/32 for 4/2/1-byte dtypes)."""
    sub_mult = 8 * max(1, 4 // itemsize)
    return bt * _round_up(rows, sub_mult) * _round_up(cols, 128) * itemsize


def _pick_batch_tile(b, c, hw, itemsize, target_bytes):
    """Largest BT whose double-buffered in+out tiles fit target_bytes, leaving
    >=4 grid steps when B allows (>=2 per TensorCore on v7x for DMA/compute
    overlap) and dividing B exactly (no padded blocks)."""
    per_bt = 4 * _tile_vmem_bytes(1, c, hw, itemsize)   # 2 buffers x (in + out)
    bt = max(1, target_bytes // per_bt)
    if b >= 2:
        bt = min(bt, max(1, b // 4))
    bt = max(1, min(bt, b))
    while b % bt:
        bt -= 1
    return bt


def se_layer(x_nchw, w1, w2):
    """SE forward, NCHW-native. x_nchw: (B, C, H, W); w1: (C//r, C); w2: (C, C//r)."""
    b, c, h, w = x_nchw.shape
    hw = h * w
    cr = w1.shape[0]
    itemsize = jnp.dtype(x_nchw.dtype).itemsize

    # Free views only — no NCHW<->NHWC transposes. The kernel consumes the
    # NCHW slab directly with HW on the lane axis. (Note: when HW < 128 the
    # lane axis is only partially filled; real SE feature maps keep HW >= 49.)
    x_flat = x_nchw.reshape(b, c, hw)
    w1t = jnp.transpose(w1)   # (C, Cr)
    w2t = jnp.transpose(w2)   # (Cr, C)

    # Generation-aware budget: ~55% of physical VMEM for the streaming tiles
    # (v7x: 64 MiB -> ~35 MiB; v5e/v6e: 128 MiB -> ~70 MiB of bigger DMAs).
    cap = _vmem_capacity_bytes()
    target_bytes = int(cap * 0.55)
    bt = _pick_batch_tile(b, c, hw, itemsize, target_bytes)

    # Real (padded) working set: double-buffered in+out tiles + weights + slack.
    weights_bytes = 2 * (_tile_vmem_bytes(1, c, cr, 4) + _tile_vmem_bytes(1, cr, c, 4))
    needed = 4 * _tile_vmem_bytes(bt, c, hw, itemsize) + weights_bytes + (2 << 20)
    if needed > cap - (8 << 20):
        # TODO(synk): add a two-pass spatially-tiled variant (pool-accumulate
        # over HW chunks, then a scale pass) for stem-resolution feature maps
        # where even a single-batch block exceeds VMEM.
        raise ValueError(
            f"SE VMEM working set {needed >> 20} MiB exceeds the {cap >> 20} MiB "
            f"budget (B={b}, C={c}, HW={hw}); spatial tiling not implemented.")
    vmem_limit = int(min(cap - (8 << 20), max(32 << 20, needed + (4 << 20))))

    grid = (pl.cdiv(b, bt),)

    cost = pl.CostEstimate(
        flops=2 * b * hw * c + 4 * b * c * cr,
        transcendentals=b * c,
        bytes_accessed=2 * b * hw * c * itemsize + 2 * c * cr * 4,
    )

    out_flat = pl.pallas_call(
        _se_kernel,
        out_shape=jax.ShapeDtypeStruct((b, c, hw), x_nchw.dtype),
        grid_spec=pltpu.PrefetchScalarGridSpec(
            num_scalar_prefetch=0,
            grid=grid,
            in_specs=[
                pl.BlockSpec((bt, c, hw), lambda i: (i, 0, 0)),
                pl.BlockSpec((c, cr), lambda i: (0, 0)),
                pl.BlockSpec((cr, c), lambda i: (0, 0)),
            ],
            out_specs=pl.BlockSpec((bt, c, hw), lambda i: (i, 0, 0)),
        ),
        compiler_params=pltpu.CompilerParams(
            dimension_semantics=("parallel",),
            vmem_limit_bytes=vmem_limit,
        ),
        cost_estimate=cost,
        input_output_aliases={0: 0},   # x slab is consumed only here
    )(x_flat, w1t, w2t)

    return out_flat.reshape(b, c, h, w)


def se_layer_ref(x_nchw, w1, w2):
    pooled = jnp.mean(x_nchw, axis=(2, 3))                 # (B, C)
    y = jnp.maximum(pooled @ w1.T, 0.0)                    # (B, C//r)
    y = jax.nn.sigmoid(y @ w2.T)                           # (B, C)
    return x_nchw * y[:, :, None, None]


if __name__ == "__main__":
    # Module config: channel=64, reduction=16 -> hidden = 4.
    B, C, H, W = 2, 64, 8, 8
    reduction = 16
    Cr = C // reduction

    key = jax.random.PRNGKey(0)
    kx, k1, k2 = jax.random.split(key, 3)

    x = jax.random.normal(kx, (B, C, H, W), dtype=jnp.float32)
    # Deterministic synthetic weights (PyTorch Linear layout: (out, in)).
    w1 = jax.random.normal(k1, (Cr, C), dtype=jnp.float32) * 0.1
    w2 = jax.random.normal(k2, (C, Cr), dtype=jnp.float32) * 0.1

    ref = se_layer_ref(x, w1, w2)

    out = se_layer(x, w1, w2)
    out = jax.block_until_ready(out)

    assert out.shape == (B, C, H, W)
    assert jnp.allclose(out, ref, atol=1e-5, rtol=1e-5)

    print("KERNEL_OK")
</pallas_src>

<mosaic_0001>
module attributes {stable_mosaic.version = 11 : i64} {
  func.func @_se_kernel(%arg0: i32, %arg1: memref<1x64x64xf32, #tpu.memory_space<vmem>>, %arg2: memref<64x4xf32, #tpu.memory_space<vmem>>, %arg3: memref<4x64xf32, #tpu.memory_space<vmem>>, %arg4: memref<1x64x64xf32, #tpu.memory_space<vmem>>) attributes {dimension_semantics = [#tpu.dimension_semantics<parallel>], iteration_bounds = array<i64: 2>, scalar_prefetch = 0 : i64, scratch_operands = 0 : i64, tpu.core_type = #tpu.core_type<tc>, window_params = [{transform_indices = @transform_0, window_bounds = array<i64: 1, 64, 64>}, {pipeline_mode = #tpu.pipeline_mode<synchronous>, transform_indices = @transform_1, window_bounds = array<i64: 64, 4>}, {pipeline_mode = #tpu.pipeline_mode<synchronous>, transform_indices = @transform_2, window_bounds = array<i64: 4, 64>}, {transform_indices = @transform_3, window_bounds = array<i64: 1, 64, 64>}]} {
    %c0 = arith.constant 0 : index
    %c0_0 = arith.constant 0 : index
    %c0_1 = arith.constant 0 : index
    %0 = vector.load %arg1[%c0, %c0_0, %c0_1] : memref<1x64x64xf32, #tpu.memory_space<vmem>>, vector<1x64x64xf32>
    %cst = arith.constant dense<0.000000e+00> : vector<1x64xf32>
    %1 = vector.multi_reduction <add>, %0, %cst [2] : vector<1x64x64xf32> to vector<1x64xf32>
    %cst_2 = arith.constant 1.562500e-02 : f32
    %2 = vector.broadcast %cst_2 : f32 to vector<1x64xf32>
    %3 = arith.mulf %1, %2 : vector<1x64xf32>
    %c0_3 = arith.constant 0 : index
    %c0_4 = arith.constant 0 : index
    %4 = vector.load %arg2[%c0_3, %c0_4] : memref<64x4xf32, #tpu.memory_space<vmem>>, vector<64x4xf32>
    %cst_5 = arith.constant dense<0.000000e+00> : vector<1x4xf32>
    %5 = tpu.matmul %3, %4, %cst_5 {dimension_numbers = #tpu.dot_dimension_numbers<[1], [0], [0], [1], [0, 0, 1, 1], [], []>} : vector<1x64xf32>, vector<64x4xf32>, vector<1x4xf32> -> vector<1x4xf32>
    %cst_6 = arith.constant 0.000000e+00 : f32
    %6 = vector.broadcast %cst_6 : f32 to vector<1x4xf32>
    %7 = arith.maximumf %5, %6 : vector<1x4xf32>
    %c0_7 = arith.constant 0 : index
    %c0_8 = arith.constant 0 : index
    %8 = vector.load %arg3[%c0_7, %c0_8] : memref<4x64xf32, #tpu.memory_space<vmem>>, vector<4x64xf32>
    %cst_9 = arith.constant dense<0.000000e+00> : vector<1x64xf32>
    %9 = tpu.matmul %7, %8, %cst_9 {dimension_numbers = #tpu.dot_dimension_numbers<[1], [0], [0], [1], [0, 0, 1, 1], [], []>} : vector<1x4xf32>, vector<4x64xf32>, vector<1x64xf32> -> vector<1x64xf32>
    %10 = arith.negf %9 : vector<1x64xf32>
    %11 = math.exp %10 : vector<1x64xf32>
    %cst_10 = arith.constant 1.000000e+00 : f32
    %12 = vector.broadcast %cst_10 : f32 to vector<1x64xf32>
    %13 = arith.addf %12, %11 : vector<1x64xf32>
    %14 = arith.divf %12, %13 : vector<1x64xf32>
    %15 = vector.shape_cast %14 : vector<1x64xf32> to vector<1x64x1xf32>
    %16 = vector.broadcast %15 : vector<1x64x1xf32> to vector<1x64x64xf32>
    %17 = arith.mulf %0, %16 : vector<1x64x64xf32>
    %c0_11 = arith.constant 0 : index
    %c0_12 = arith.constant 0 : index
    %c0_13 = arith.constant 0 : index
    %18 = vector.load %arg4[%c0_11, %c0_12, %c0_13] : memref<1x64x64xf32, #tpu.memory_space<vmem>>, vector<1x64x64xf32>
    tpu.vector_store %arg4[%c0_11, %c0_12, %c0_13], %17 {strides = array<i32>} : memref<1x64x64xf32, #tpu.memory_space<vmem>>, vector<1x64x64xf32>,
    return
  }
  func.func @transform_0(%arg0: i32) -> (i32, i32, i32) {
    %c0_i32 = arith.constant 0 : i32
    %c0_i32_0 = arith.constant 0 : i32
    %c0_i32_1 = arith.constant 0 : i32
    return %arg0, %c0_i32, %c0_i32_0 : i32, i32, i32
  }
  func.func @transform_1(%arg0: i32) -> (i32, i32) {
    %c0_i32 = arith.constant 0 : i32
    %c0_i32_0 = arith.constant 0 : i32
    %c0_i32_1 = arith.constant 0 : i32
    return %c0_i32, %c0_i32_0 : i32, i32
  }
  func.func @transform_2(%arg0: i32) -> (i32, i32) {
    %c0_i32 = arith.constant 0 : i32
    %c0_i32_0 = arith.constant 0 : i32
    %c0_i32_1 = arith.constant 0 : i32
    return %c0_i32, %c0_i32_0 : i32, i32
  }
  func.func @transform_3(%arg0: i32) -> (i32, i32, i32) {
    %c0_i32 = arith.constant 0 : i32
    %c0_i32_0 = arith.constant 0 : i32
    %c0_i32_1 = arith.constant 0 : i32
    return %arg0, %c0_i32, %c0_i32_0 : i32, i32, i32
  }
}

</mosaic_0001>

<bundles_post_ra>
// kernel: tpu_custom_call.1
= control target key start
LH: loop header
LB: loop body
LE: loop exit
PB: predicated region body
PF: predicated region fallthrough
CT: control target
= control target key end

     0   :  { %8 = vsyncpa [#allocation3], 0  ;;  %s916_s0 = inlined_call_operand.hbm [shape: f32[2,64,64], index: 0, kind: input, shape index: {}, may-alias: {0,3}]   ;;  %s917_s1 = inlined_call_operand.vmem [shape: f32[64,4], index: 1, kind: input, shape index: {}]   ;;  %s918_s2 = inlined_call_operand.vmem [shape: f32[4,64], index: 2, kind: input, shape index: {}]   ;;  %s919_s3 = inlined_call_operand.hbm [shape: f32[2,64,64], index: 3, kind: output, shape index: {}, may-alias: {0,3}]  }
   0x1   :  { %10 = vsyncpa [#allocation3 + $0x1], 0 }
   0x2   :  { %11 = vsyncpa [#allocation4], 0 }
   0x3   :  { %13 = vsyncpa [#allocation4 + $0x1], 0  ;;  %s709_s12 = smov 0   ;;  %s711_s13 = smov 0  }
   0x4   :  { %s713_s14 = smov 0   ;;  %s715_s15 = smov 0  }
   0x5 LB: > { %s730_s16 = sadd.s32 4294967295, %s683_s15   ;;  %s504_s17 = sadd.s32 4294967294, %s683_s15   ;;  %s683_s15 = sphi %s715_s15, %s929_s15   ;;  %s679_s14 = sphi %s713_s14, %s928_s14   ;;  %s675_s13 = sphi %s711_s13, %s927_s13   ;;  %s671_s12 = sphi %s709_s12, %s926_s12  }
   0x6   : > { %s734_s18 = sadd.s32 1, %s683_s15   ;;  %s26_s19 = sadd.s32 1, %s679_s14 }
   0x7   : > { %s23_s20 = ssub.s32 %s683_s15, %s734_s18  ;;  %p33_p0 = scmp.ne.s32.totalorder %s679_s14, %s675_s13 }
   0x8   : > { %p24_p1 = scmp.eq.s32.totalorder %s23_s20, 0  ;;  %p34_p2 = scmp.eq.s32.totalorder %s683_s15, 0 }
   0x9   : > { %p39_p3 = scmp.ne.s32.totalorder %s675_s13, %s671_s12  ;;  %p40_p4 = scmp.eq.s32.totalorder %s730_s16, 0 }
   0xa   : > { %s746_s21 = scalar_select %p24_p1, %s679_s14, %s26_s19  }
   0xb   : > { %p748_p5 = por %p34_p2, %p33_p0  ;;  %p752_p6 = por %p40_p4, %p39_p3 }
   0xc   : > { %p105_p7 = scmp.eq.s32.totalorder %s730_s16, 1  ;;  %p111_p8 = scmp.eq.s32.totalorder %s504_s17, 1 }
   0xd   : > { %p536_p10 = scmp.lt.s32.totalorder %s683_s15, 2  ;;  %s137_s26 = sand.u32 1, %s679_s14  }
   0xe   : > { %p759_p11 = por %p105_p7, %p33_p0  ;;  %p763_p12 = por %p111_p8, %p39_p3 }
   0xf   : > { %s522_s27 = sshll.u32 %s683_s15, 6  ;;  %s507_s28 = sshll.u32 %s137_s26, 6 }
  0x10   : > { %s146_s4 = scalar_lea.hbm %s916_s0, %s522_s27  ;;  %s141_s6 = scalar_lea.vmem [#allocation2], %s507_s28 }
  0x11   : > { %s147_s5 = sshll.u32 %s146_s4, 4  ;;  %s149_s7 = sshll.u32 %s141_s6, 4  ;;  %s148_s5 = int_to_ptr.hbm [resolvable:$true] %s147_s5  ;;  %s150_s7 = int_to_ptr.vmem [resolvable:$true] %s149_s7 }
  0x12   : > { %p774_p13 = pnand %p536_p10, %p748_p5  ;;  %p510_p0 = scmp.ge.s32.totalorder %s683_s15, 1 }
  0x13   : > { %p157_p1 = scmp.lt.s32.totalorder %s683_s15, 3  ;;  %s138_s9 = scalar_lea.sflag [#allocation3], %s137_s26 }
  0x14   : > { %s587_s10 = sshra.s32 %s148_s5, 4  ;;  %p591_p3 = pneg %p774_p13  ;;  %s588_s10 = int_to_ptr.hbm [resolvable:$true] %s587_s10 }
  0x15   : > { %s589_s11 = scalar_lea.hbm %s588_s10, 64  ;;  %s594_s20 = scalar_lea.hbm %s916_s0, 128 }
  0x16   : > { %p590_p2 = scmp.ne.s32.totalorder %s588_s10, %s589_s11  ;;  %p595_p5 = scmp.lt.s32.totalorder %s588_s10, %s916_s0 }
  0x17   : > { %p596_p8 = scmp.lt.s32.totalorder %s594_s20, %s589_s11 }
  0x18   : > { %p592_p4 = pnand %p591_p3, %p590_p2 }
  0x19   : > { %p597_p10 = por %p596_p8, %p595_p5 }
  0x1a   : > { %p593_p7 = pneg %p592_p4 }
  0x1c   : > { %p598_p9 = pnand %p597_p10, %p593_p7 }
  0x1e   : > { %601 = shalt.err (!%p598_p9)
}
  0x1f   : > { %s685_s26 = smov 128   ;;  %s686_s28 = smov 8  }
  0x20   : > { %531 = dma.hbm_to_vmem [thread:$0]  (!%p774_p13), %s148_s5, 1024, %s150_s7, %s138_s9, %s685_s26, %s685_s26, %s686_s28  }
  0x21   : > { %p158_p2 = pnand %p510_p0, %p157_p1 }
  0x22   : > { %s795_s29 = sand.u32 (!%p158_p2), 1, %s675_s13  }
  0x23   : > { %161 = sbr.rel (%p158_p2) target bundleno = 618 (0x26a), region = 32  ;;  %s511_s30 = sshll.u32 (!%p158_p2), %s795_s29, 6 }
  0x24   : > { %s164_s4 = scalar_lea.sflag (!%p158_p2), [#allocation3], %s795_s29  ;;  %s167_s6 = scalar_lea.vmem (!%p158_p2), [#allocation2], %s511_s30 }
  0x28   : > { %662 = dma.done.wait (%p752_p6), %s164_s4, 1024  }
  0x29   : > { %664 = vsyncadd (%p752_p6), %s164_s4, 4294966272  ;;  %vm199_vm0 = vcmask 523264   ;;  %v805_v0 = vld [vmem:[%s167_s6] sm:$0xff]  ;;  %v807_v1 = vld [vmem:[%s167_s6 + $0x10] sm:$0xff]  ;;  %v248_v24 = vlaneseq  ;;  %vm253_vm1 = vcmask 130112   ;;  %vm257_vm2 = vcmask 195712  }
  0x2a   : > { %v809_v2 = vld [vmem:[%s167_s6 + $0x20] sm:$0xff]  ;;  %v200_v3 = vsel %vm199_vm0, %v805_v0, 0.0  ;;  %v206_v4 = vsel %vm199_vm0, %v807_v1, 0.0  ;;  %v817_v6 = vld [vmem:[%s167_s6 + $0x8] sm:$0xff]  ;;  %v819_v7 = vld [vmem:[%s167_s6 + $0x18] sm:$0xff]  ;;  %vm261_vm3 = vcmask 261312  }
  0x2b   : > { %v212_v5 = vsel %vm199_vm0, %v809_v2, 0.0  ;;  %201 = vadd.xlane.f32.xlu0 %v200_v3  ;;  %207 = vadd.xlane.f32.xlu1 %v206_v4  ;;  %v821_v8 = vld [vmem:[%s167_s6 + $0x28] sm:$0xff]  ;;  %v203_v9 = vsel %vm199_vm0, %v817_v6, 0.0  ;;  %v209_v10 = vsel %vm199_vm0, %v819_v7, 0.0  ;;  %v829_v12 = vld [vmem:[%s167_s6 + $0x30] sm:$0xff]  ;;  %v831_v13 = vld [vmem:[%s167_s6 + $0x38] sm:$0xff] }
  0x2c   : > { %213 = vadd.xlane.f32.xlu2 %v212_v5  ;;  %v215_v11 = vsel %vm199_vm0, %v821_v8, 0.0  ;;  %v218_v14 = vsel %vm199_vm0, %v829_v12, 0.0  ;;  %v221_v15 = vsel %vm199_vm0, %v831_v13, 0.0  ;;  %v239_v16 = vld [vmem:[%s917_s1 + $0x38] sm:$0xff]  ;;  %v238_v17 = vld [vmem:[%s917_s1 + $0x30] sm:$0xff]  ;;  %v237_v18 = vld [vmem:[%s917_s1 + $0x28] sm:$0xff] }
  0x2d   : > { %289 = vmatpush.msra.mxu0 %v239_v16  ;;  %v236_v19 = vld [vmem:[%s917_s1 + $0x20] sm:$0xff]  ;;  %v235_v20 = vld [vmem:[%s917_s1 + $0x18] sm:$0xff]  ;;  %v234_v21 = vld [vmem:[%s917_s1 + $0x10] sm:$0xff]  ;;  %v249_v28 = vand.u32 127, %v248_v24  ;;  %vm265_vm4 = vcmask 326912   ;;  %vm269_vm5 = vcmask 392512  }
  0x2e   : > { %v233_v22 = vld [vmem:[%s917_s1 + $0x8] sm:$0xff]  ;;  %v232_v23 = vld [vmem:[%s917_s1] sm:$0xff]  ;;  %vm273_vm6 = vcmask 458112   ;;  %vm277_vm7 = vcmask 523712   ;;  %vm307_vm8 = vcmask 1043456   ;;  %vm303_vm9 = vcmask 31744  }
  0x2f   : > { %290 = vmatpush.msra.mxu0 %v238_v17  ;;  %v251_v30 = vadd.s32 4294967288, %v249_v28  ;;  %v259_v31 = vadd.s32 4294967272, %v249_v28  ;;  %v255_v32 = vadd.s32 4294967280, %v249_v28  ;;  %v263_v39 = vadd.s32 4294967264, %v249_v28  ;;  %v302_v3 = vld [vmem:[%s918_s2] sm:$0xf] }
  0x30   : > { %v267_v45 = vadd.s32 4294967256, %v249_v28  ;;  %v271_v51 = vadd.s32 4294967248, %v249_v28  ;;  %v275_v52 = vadd.s32 4294967240, %v249_v28  ;;  %514 = vmatpush.msk.msra.mxu1 %vm307_vm8, %v302_v3  ;;  %s190_s7 = scalar_lea.vmem [#allocation5], %s511_s30  ;;  %s523_s30 = sshll.u32 %s730_s16, 6 }
  0x31   : > { %291 = vmatpush.msra.mxu0 %v237_v18  ;;  %s427_s10 = scalar_lea.hbm %s919_s3, %s523_s30  ;;  %s428_s11 = sshll.u32 %s190_s7, 4  ;;  %s429_s11 = int_to_ptr.vmem [resolvable:$true] %s428_s11 }
  0x32   : > { %s430_s17 = sshll.u32 %s427_s10, 4  ;;  %s416_s16 = scalar_lea.sflag [#allocation4], %s795_s29  ;;  %s431_s17 = int_to_ptr.hbm [resolvable:$true] %s430_s17 }
  0x33   : > { %204 = vadd.xlane.f32.xlu0 %v203_v9  ;;  %210 = vadd.xlane.f32.xlu1 %v209_v10  ;;  %v352_v9 = vshrl.u32 %v248_v24, 7  ;;  %s631_s19 = sshra.s32 %s431_s17, 4  ;;  %s637_s26 = scalar_lea.hbm %s919_s3, 128  ;;  %s632_s19 = int_to_ptr.hbm [resolvable:$true] %s631_s19 }
  0x34   : > { %216 = vadd.xlane.f32.xlu2 %v215_v11  ;;  %292 = vmatpush.msra.mxu0 %v236_v19  ;;  %s633_s20 = scalar_lea.hbm %s632_s19, 64  ;;  %p638_p0 = scmp.lt.s32.totalorder %s632_s19, %s919_s3 }
  0x35   : > { %574 = vset.pattern.permute.xlu2 %v352_v9  ;;  %v365_v10 = vadd.s32 16, %v352_v9  ;;  %v359_v11 = vadd.s32 8, %v352_v9  ;;  %p634_p6 = scmp.ne.s32.totalorder %s632_s19, %s633_s20  ;;  %p639_p1 = scmp.lt.s32.totalorder %s637_s26, %s633_s20 }
  0x36   : > { %293 = vmatpush.msra.mxu0 %v235_v20 }
  0x37   : > { %576 = vset.pattern.permute.xlu1 %v365_v10  ;;  %575 = vset.pattern.permute.xlu0 %v359_v11  ;;  %p635_p9 = pnand %p634_p6, %p759_p11  ;;  %p640_p3 = por %p639_p1, %p638_p0 }
  0x38   : > { %294 = vmatpush.msra.mxu0 %v234_v21 }
  0x39   : > { %p636_p13 = pneg %p635_p9 }
  0x3a   : > { %295 = vmatpush.msra.mxu0 %v233_v22 }
  0x3b   : > { %219 = vadd.xlane.f32.xlu0 %v218_v14  ;;  %222 = vadd.xlane.f32.xlu1 %v221_v15  ;;  %p641_p4 = pnand %p640_p3, %p636_p13 }
  0x3c   : > { %296 = vmatpush.msra.mxu0 %v232_v23 }
  0x9e   : > { %v202_v25 = vpop.xlane.xlu0 %201  ;;  %v208_v26 = vpop.xlane.xlu1 %207 }
  0x9f   : > { %v214_v27 = vpop.xlane.xlu2 %213  ;;  %v224_v29 = vmul.f32 0.015625, %v202_v25  ;;  %v226_v33 = vmul.f32 0.015625, %v208_v26 }
  0xa0   : > { %v228_v41 = vmul.f32 0.015625, %v214_v27 }
  0xa1   : > { %v250_v40 = vperm.slane %v224_v29, %v249_v28  ;;  %v256_v44 = vperm.slane %v226_v33, %v255_v32  ;;  %v383_v29 = vadd.s32 40, %v352_v9  ;;  %v377_v32 = vadd.s32 32, %v352_v9 }
  0xa2   : > { %v264_v49 = vperm.slane %v228_v41, %v263_v39  ;;  %v389_v33 = vadd.s32 48, %v352_v9 }
  0xa6   : > { %v205_v34 = vpop.xlane.xlu0 %204  ;;  %v211_v35 = vpop.xlane.xlu1 %210 }
  0xa7   : > { %v225_v36 = vmul.f32 0.015625, %v205_v34  ;;  %v227_v37 = vmul.f32 0.015625, %v211_v35  ;;  %v217_v38 = vpop.xlane.xlu2 %216 }
  0xa8   : > { %v229_v46 = vmul.f32 0.015625, %v217_v38 }
  0xa9   : > { %v252_v42 = vperm.slane %v225_v36, %v251_v30  ;;  %v260_v43 = vperm.slane %v227_v37, %v259_v31  ;;  %v371_v30 = vadd.s32 24, %v352_v9  ;;  %v395_v31 = vadd.s32 56, %v352_v9 }
  0xaa   : > { %v268_v53 = vperm.slane %v229_v46, %v267_v45 }
  0xab   : > { %v254_v47 = vsel %vm253_vm1, %v252_v42, %v250_v40 }
  0xac   : > { %v258_v48 = vsel %vm257_vm2, %v256_v44, %v254_v47 }
  0xad   : > { %v262_v50 = vsel %vm261_vm3, %v260_v43, %v258_v48 }
  0xae   : > { %v220_v54 = vpop.xlane.xlu0 %219  ;;  %v223_v55 = vpop.xlane.xlu1 %222  ;;  %v266_v58 = vsel %vm265_vm4, %v264_v49, %v262_v50 }
  0xaf   : > { %v230_v56 = vmul.f32 0.015625, %v220_v54  ;;  %v231_v57 = vmul.f32 0.015625, %v223_v55  ;;  %v270_v61 = vsel %vm269_vm5, %v268_v53, %v266_v58 }
  0xb1   : > { %v272_v59 = vperm.slane %v230_v56, %v271_v51  ;;  %v276_v60 = vperm.slane %v231_v57, %v275_v52 }
  0xb3   : > { %v274_v62 = vsel %vm273_vm6, %v272_v59, %v270_v61 }
  0xb4   : > { %v278_v63 = vsel %vm277_vm7, %v276_v60, %v274_v62 }
  0xb5   : > { %513 = vmatmul.msk.f32.vlgmr.msra.gmra.mxu0 %vm199_vm0, %v278_v63 }
 0x132   : > { %v298_v4 = vpop.f32.mrf.mxu0 }
 0x133   : > { %v301_v5 = vmax.f32 %v298_v4, 0.0 }
 0x135   : > { %515 = vmatmul.msk.f32.vlgmr.msra.gmra.mxu1 %vm303_vm9, %v301_v5 }
 0x1b2   : > { %v328_v14 = vpop.f32.mrf.mxu1 }
 0x1b3   : > { %v516_v15 = vmul.f32 -1.442695, %v328_v14 }
 0x1b5   : > { %583 = vpow2.f32 %v516_v15 }
 0x1bb   : > { %v584_v16 = vpop.eup %583 }
 0x1bc   : > { %v334_v17 = vadd.f32 1.0, %v584_v16 }
 0x1be   : > { %585 = vrcp.f32 %v334_v17  ;;  %v346_v21 = vand.u32 2147483648, %v334_v17  ;;  %v344_v23 = vand.u32 2147483647, %v334_v17  ;;  %vm340_vm11 = vweird.f32 %v334_v17 }
 0x1c0   : > { %v347_v24 = vor.u32 1.1754944e-38, %v346_v21  ;;  %vm345_vm13 = vcmp.eq.f32.partialorder %v344_v23, 8.507059e+37 }
 0x1c4   : > { %v586_v18 = vpop.eup %585 }
 0x1c5   : > { %v336_v19 = vmul.f32 %v586_v18, %v334_v17  ;;  %vm341_vm10 = vweird.f32 %v586_v18 }
 0x1c6   : > { %vm342_vm12 = vmor %vm340_vm11, %vm341_vm10 }
 0x1c7   : > { %v337_v20 = vsub.f32 1.0, %v336_v19 }
 0x1c9   : > { %v338_v22 = vmul.f32 %v586_v18, %v337_v20 }
 0x1cb   : > { %v339_v25 = vadd.f32 %v586_v18, %v338_v22 }
 0x1cd   : > { %v343_v26 = vsel %vm342_vm12, %v586_v18, %v339_v25 }
 0x1ce   : > { %v348_v27 = vsel %vm345_vm13, %v347_v24, %v343_v26 }
 0x1cf   : > { %v350_v28 = vperm.slane %v348_v27, 0 }
 0x1d1   : > { %367 = vperm.xlu1 %576, %v350_v28   ;;  %361 = vperm.xlu0 %575, %v350_v28  }
 0x1d2   : > { %355 = vperm.xlu2 %574, %v350_v28  }
 0x1d9   : > { %579 = vset.pattern.permute.xlu1 %v383_v29  ;;  %582 = vset.pattern.permute.xlu0 %v395_v31 }
 0x1da   : > { %577 = vset.pattern.permute.xlu2 %v371_v30 }
 0x1e1   : > { %385 = vperm.xlu1 %579, %v350_v28  }
 0x1e2   : > { %373 = vperm.xlu2 %577, %v350_v28  }
 0x1e9   : > { %581 = vset.pattern.permute.xlu1 %v395_v31 }
 0x1ea   : > { %578 = vset.pattern.permute.xlu2 %v377_v32 }
 0x1f1   : > { %397 = vperm.xlu1 %581, %v350_v28  }
 0x1f2   : > { %379 = vperm.xlu2 %578, %v350_v28  }
 0x1fa   : > { %580 = vset.pattern.permute.xlu2 %v389_v33 }
 0x202   : > { %391 = vperm.xlu2 %580, %v350_v28  }
 0x22c   : > { %v356_v34 = vpop.permute.xlu2 %355 }
 0x22d   : > { %v399_v35 = vmul.f32 %v356_v34, %v805_v0 }
 0x22f   : > { %407 = vst.msk [vmem:[%s190_s7] sm:$0xff] %vm199_vm0, %v399_v35 }
 0x23c   : > { %v374_v36 = vpop.permute.xlu2 %373 }
 0x23d   : > { %v402_v37 = vmul.f32 %v374_v36, %v819_v7 }
 0x23f   : > { %410 = vst.msk [vmem:[%s190_s7 + $0x18] sm:$0xff] %vm199_vm0, %v402_v37 }
 0x243   : > { %v368_v38 = vpop.permute.xlu1 %367  ;;  %v362_v39 = vpop.permute.xlu0 %361 }
 0x244   : > { %v401_v40 = vmul.f32 %v368_v38, %v807_v1  ;;  %v400_v41 = vmul.f32 %v362_v39, %v817_v6 }
 0x246   : > { %409 = vst.msk [vmem:[%s190_s7 + $0x10] sm:$0xff] %vm199_vm0, %v401_v40 }
 0x247   : > { %408 = vst.msk [vmem:[%s190_s7 + $0x8] sm:$0xff] %vm199_vm0, %v400_v41 }
 0x24c   : > { %v380_v0 = vpop.permute.xlu2 %379 }
 0x24d   : > { %v403_v42 = vmul.f32 %v380_v0, %v809_v2 }
 0x24f   : > { %411 = vst.msk [vmem:[%s190_s7 + $0x20] sm:$0xff] %vm199_vm0, %v403_v42 }
 0x253   : > { %v386_v43 = vpop.permute.xlu1 %385 }
 0x254   : > { %v404_v7 = vmul.f32 %v386_v43, %v821_v8 }
 0x256   : > { %412 = vst.msk [vmem:[%s190_s7 + $0x28] sm:$0xff] %vm199_vm0, %v404_v7 }
 0x25c   : > { %v392_v44 = vpop.permute.xlu2 %391 }
 0x25d   : > { %v405_v1 = vmul.f32 %v392_v44, %v829_v12 }
 0x25f   : > { %413 = vst.msk [vmem:[%s190_s7 + $0x30] sm:$0xff] %vm199_vm0, %v405_v1 }
 0x263   : > { %v398_v2 = vpop.permute.xlu1 %397 }
 0x264   : > { %v406_v6 = vmul.f32 %v398_v2, %v831_v13 }
 0x266   : > { %414 = vst.msk [vmem:[%s190_s7 + $0x38] sm:$0xff] %vm199_vm0, %v406_v6 }
 0x267   : > { %644 = shalt.err (!%p641_p4)
}
 0x268   : > { %s687_s29 = smov 128   ;;  %s688_s6 = smov 8  }
 0x269   : > { %526 = dma.vmem_to_hbm [thread:$0]  (%p759_p11), %s429_s11, 1024, %s431_s17, %s416_s16, %s687_s29, %s687_s29, %s688_s6  }
 0x26a PF: > { %s445_s23 = sand.u32 1, %s671_s12   ;;  %p925_p7 = scmp.ge.s32.totalorder %s683_s15, 2 }
 0x26b   : > { %s446_s5 = scalar_lea.sflag [#allocation4], %s445_s23 }
 0x26c   : > { %p533_p5 = pnand %p925_p7, %p763_p12 }
 0x26e   : > { %p534_p8 = pneg %p533_p5 }
 0x270   : > { %666 = dma.done.wait (%p534_p8), %s446_s5, 1024  }
 0x271   : > { %668 = vsyncadd (%p534_p8), %s446_s5, 4294966272  ;;  %p16_p10 = scmp.ge.s32.totalorder %s734_s18, 4   ;;  %s926_s12 = smov %s675_s13 }
 0x272   : > { %s927_s13 = smov %s679_s14  ;;  %s928_s14 = smov %s746_s21 }
 0x273   : > { %s929_s15 = smov %s734_s18  ;;  %18 = sbr.rel (!%p16_p10) target bundleno = 5 (0x5), region = 77 }
 0x278   :  { %452 = vsyncpa [#allocation3], 1 }
 0x279   :  { %454 = vsyncpa [#allocation3 + $0x1], 1 }
 0x27a   :  { %455 = vsyncpa [#allocation4], 1 }
 0x27b   :  { %457 = vsyncpa [#allocation4 + $0x1], 1 }

</bundles_post_ra>
